<compile_context>
chip_gen: v5e
topology: v5e:2x2
jax: 0.10.0
libtpu: 0.0.40
codegen_flags: <defaults>
</compile_context>

<pallas_src>
import jax
import jax.numpy as jnp
from jax.experimental import pallas as pl
from jax.experimental.pallas import tpu as pltpu


# ---------------------------------------------------------------------------
# Kernel: one row-tile of the fused 3-layer MLP.  Weights fully VMEM-resident.
# ---------------------------------------------------------------------------
def _mlp2_kernel(x_ref, w1_ref, b1_ref, w2_ref, b2_ref, w3_ref, b3_ref, y_ref):
    # bf16 MXU inputs, f32 accumulation, f32 VPU epilogue (bias + ReLU).
    x = x_ref[...].astype(jnp.bfloat16)                              # (TM, D)

    h1 = jnp.dot(x, w1_ref[...], preferred_element_type=jnp.float32)
    h1 = jnp.maximum(h1 + b1_ref[...], 0.0)                          # (TM, Hp) f32

    h2 = jnp.dot(h1.astype(jnp.bfloat16), w2_ref[...],
                 preferred_element_type=jnp.float32)
    h2 = jnp.maximum(h2 + b2_ref[...], 0.0)                          # (TM, Hp) f32

    y = jnp.dot(h2.astype(jnp.bfloat16), w3_ref[...],
                preferred_element_type=jnp.float32)
    y_ref[...] = (y + b3_ref[...]).astype(y_ref.dtype)               # (TM, O)


# ---------------------------------------------------------------------------
# Helpers
# ---------------------------------------------------------------------------
def _round_up(n, m):
    return ((n + m - 1) // m) * m


def _vmem_capacity_bytes():
    """Physical VMEM on this chip; conservative fallback if unavailable."""
    try:
        info = pltpu.get_tpu_info()
        cap = getattr(info, "vmem_capacity_bytes", None)
        if cap:
            return int(cap)
    except Exception:
        pass
    return 64 << 20  # v7x per-TC size; safe lower bound everywhere


# ---------------------------------------------------------------------------
# Wrapper
# ---------------------------------------------------------------------------
def mlp2_forward(x, params, *, tm=1024):
    """x: (B, L, D). params: PyTorch-convention weights (w: (out, in), b: (out,)).

    Returns (o, x_out) with o = x_out.sum(axis=1), matching MLP2.forward.
    """
    B, L, D = x.shape
    w1, b1 = params["w1"], params["b1"]          # (H, D), (H,)
    w2, b2 = params["w2"], params["b2"]          # (H, H), (H,)
    w3, b3 = params["w3"], params["b3"]          # (O, H), (O,)
    H = w1.shape[0]
    O = w3.shape[0]

    # --- feature padding: only H (matmul N dim of layers 1/2) needs lanes ---
    Hp = _round_up(H, 128)

    # --- per-generation VMEM budget and row-tile sizing ----------------------
    vmem_cap = _vmem_capacity_bytes()
    vmem_budget = int(vmem_cap * 0.85)
    tm_max_hw = 1024 if vmem_cap >= (96 << 20) else 512   # v5e/v6e vs v7x

    # Resident-weight bytes (bf16), worst case double-buffered; per-row bytes:
    # x/y tiles double-buffered in f32 + h1/h2 f32 temporaries + bf16 casts.
    w_cost = 2 * 2 * (D * Hp + Hp * Hp + Hp * O) + 2 * 4 * (2 * Hp + O)
    row_cost = 2 * 4 * (D + O) + 12 * Hp
    tm_fit = (vmem_budget - w_cost - (8 << 20)) // max(row_cost, 1)
    # TODO(synk): if w_cost approaches vmem_budget (very large H), add a
    # K-tiling grid axis over Hp (marked "arbitrary") instead of shrinking TM.

    N = B * L
    TM = min(tm, tm_max_hw, max(16, int(tm_fit)), _round_up(N, 16))
    TM = max(16, (TM // 16) * 16)
    # Prefer >= 4 grid steps (>= 2 per TensorCore on v7x) when rows allow it.
    while TM > 256 and -(-N // TM) < 4:
        TM = max(256, TM // 2)
    TM = max(16, (TM // 16) * 16)
    Np = _round_up(N, TM)
    grid = (Np // TM,)

    # --- operand preparation (no D/O padding; rows padded only if needed) ---
    x_flat = x.reshape(N, D)
    if Np != N:
        x_flat = jnp.pad(x_flat, ((0, Np - N), (0, 0)))

    w1p = jnp.pad(w1.T, ((0, 0), (0, Hp - H))).astype(jnp.bfloat16)   # (D, Hp)
    w2p = jnp.pad(w2.T, ((0, Hp - H), (0, Hp - H))).astype(jnp.bfloat16)  # (Hp, Hp)
    w3p = jnp.pad(w3.T, ((0, Hp - H), (0, 0))).astype(jnp.bfloat16)   # (Hp, O)
    b1p = jnp.pad(b1, (0, Hp - H)).reshape(1, Hp).astype(jnp.float32)
    b2p = jnp.pad(b2, (0, Hp - H)).reshape(1, Hp).astype(jnp.float32)
    b3p = b3.reshape(1, O).astype(jnp.float32)

    def _run(single_buffer_weights):
        def const(shape):
            if single_buffer_weights:
                return pl.BlockSpec(shape, lambda i: (0, 0),
                                    pipeline_mode=pl.Buffered(1))
            return pl.BlockSpec(shape, lambda i: (0, 0))

        wbuf = 1 if single_buffer_weights else 2
        w_bytes = wbuf * (2 * (D * Hp + Hp * Hp + Hp * O) + 4 * (2 * Hp + O))
        act_bytes = 2 * TM * (D + O) * 4            # double-buffered x / y tiles
        tmp_bytes = TM * Hp * 12                    # h1/h2 f32 + bf16 casts
        vmem_need = w_bytes + act_bytes + tmp_bytes + (4 << 20)
        vmem_limit = min(max(vmem_need, 32 << 20), vmem_budget)

        return pl.pallas_call(
            _mlp2_kernel,
            out_shape=jax.ShapeDtypeStruct((Np, O), jnp.float32),
            grid=grid,
            in_specs=[
                pl.BlockSpec((TM, D), lambda i: (i, 0)),
                const((D, Hp)), const((1, Hp)),
                const((Hp, Hp)), const((1, Hp)),
                const((Hp, O)), const((1, O)),
            ],
            out_specs=pl.BlockSpec((TM, O), lambda i: (i, 0)),
            compiler_params=pltpu.CompilerParams(
                dimension_semantics=("parallel",),
                vmem_limit_bytes=vmem_limit,
            ),
        )(x_flat, w1p, b1p, w2p, b2p, w3p, b3p)

    try:
        y_flat = _run(True)        # single-buffered resident weights
    except Exception:
        y_flat = _run(False)       # fallback: default (double) buffering

    x_out = (y_flat if Np == N else y_flat[:N]).reshape(B, L, O)
    o = x_out.sum(axis=1)          # cheap mem-bound XLA op; keeps grid parallel
    return o, x_out


# ---------------------------------------------------------------------------
# Pure-JAX reference mirroring the PyTorch forward (f32 end to end).
# ---------------------------------------------------------------------------
def mlp2_reference(x, params):
    h1 = jax.nn.relu(x @ params["w1"].T + params["b1"])
    h2 = jax.nn.relu(h1 @ params["w2"].T + params["b2"])
    y = h2 @ params["w3"].T + params["b3"]
    return y.sum(axis=1), y


def init_params(key, input_size, hidden_size, outdim):
    """Deterministic init matching nn.Linear shapes (weight: (out, in))."""
    ks = jax.random.split(key, 6)

    def lin(kw, kb, fan_in, fan_out):
        bound = 1.0 / jnp.sqrt(fan_in)
        w = jax.random.uniform(kw, (fan_out, fan_in), jnp.float32, -bound, bound)
        b = jax.random.uniform(kb, (fan_out,), jnp.float32, -bound, bound)
        return w, b

    w1, b1 = lin(ks[0], ks[1], input_size, hidden_size)
    w2, b2 = lin(ks[2], ks[3], hidden_size, hidden_size)
    w3, b3 = lin(ks[4], ks[5], hidden_size, outdim)
    return dict(w1=w1, b1=b1, w2=w2, b2=b2, w3=w3, b3=b3)


if __name__ == "__main__":
    B, L = 2, 8
    input_size, hidden_size, outdim = 32, 32, 16

    key = jax.random.PRNGKey(0)
    k_x, k_p = jax.random.split(key)
    x = jax.random.normal(k_x, (B, L, input_size), jnp.float32)
    params = init_params(k_p, input_size, hidden_size, outdim)

    o, x_out = mlp2_forward(x, params)
    jax.block_until_ready((o, x_out))

    o_ref, x_ref = mlp2_reference(x, params)
    assert o.shape == (B, outdim) and x_out.shape == (B, L, outdim)
    # bf16 matmul inputs with f32 accumulation -> loosened tolerances vs f32 ref.
    assert jnp.allclose(x_out, x_ref, atol=5e-2, rtol=5e-2)
    assert jnp.allclose(o, o_ref, atol=5e-2, rtol=5e-2)

    print("KERNEL_OK")
</pallas_src>

<mosaic_0001>
module attributes {stable_mosaic.version = 11 : i64} {
  func.func @_mlp2_kernel(%arg0: i32, %arg1: memref<16x32xf32, #tpu.memory_space<vmem>>, %arg2: memref<32x128xbf16, #tpu.memory_space<vmem>>, %arg3: memref<1x128xf32, #tpu.memory_space<vmem>>, %arg4: memref<128x128xbf16, #tpu.memory_space<vmem>>, %arg5: memref<1x128xf32, #tpu.memory_space<vmem>>, %arg6: memref<128x16xbf16, #tpu.memory_space<vmem>>, %arg7: memref<1x16xf32, #tpu.memory_space<vmem>>, %arg8: memref<16x16xf32, #tpu.memory_space<vmem>>) attributes {dimension_semantics = [#tpu.dimension_semantics<parallel>], iteration_bounds = array<i64: 1>, scalar_prefetch = 0 : i64, scratch_operands = 0 : i64, tpu.core_type = #tpu.core_type<tc>, window_params = [{transform_indices = @transform_0, window_bounds = array<i64: 16, 32>}, {pipeline_mode = #tpu.pipeline_mode<synchronous>, transform_indices = @transform_1, window_bounds = array<i64: 32, 128>}, {pipeline_mode = #tpu.pipeline_mode<synchronous>, transform_indices = @transform_2, window_bounds = array<i64: 1, 128>}, {pipeline_mode = #tpu.pipeline_mode<synchronous>, transform_indices = @transform_3, window_bounds = array<i64: 128, 128>}, {pipeline_mode = #tpu.pipeline_mode<synchronous>, transform_indices = @transform_4, window_bounds = array<i64: 1, 128>}, {pipeline_mode = #tpu.pipeline_mode<synchronous>, transform_indices = @transform_5, window_bounds = array<i64: 128, 16>}, {pipeline_mode = #tpu.pipeline_mode<synchronous>, transform_indices = @transform_6, window_bounds = array<i64: 1, 16>}, {transform_indices = @transform_7, window_bounds = array<i64: 16, 16>}]} {
    %c0 = arith.constant 0 : index
    %c0_0 = arith.constant 0 : index
    %0 = vector.load %arg1[%c0, %c0_0] : memref<16x32xf32, #tpu.memory_space<vmem>>, vector<16x32xf32>
    %1 = arith.truncf %0 : vector<16x32xf32> to vector<16x32xbf16>
    %c0_1 = arith.constant 0 : index
    %c0_2 = arith.constant 0 : index
    %2 = vector.load %arg2[%c0_1, %c0_2] : memref<32x128xbf16, #tpu.memory_space<vmem>>, vector<32x128xbf16>
    %cst = arith.constant dense<0.000000e+00> : vector<16x128xf32>
    %3 = tpu.matmul %1, %2, %cst {dimension_numbers = #tpu.dot_dimension_numbers<[1], [0], [0], [1], [0, 0, 1, 1], [], []>} : vector<16x32xbf16>, vector<32x128xbf16>, vector<16x128xf32> -> vector<16x128xf32>
    %c0_3 = arith.constant 0 : index
    %c0_4 = arith.constant 0 : index
    %4 = vector.load %arg3[%c0_3, %c0_4] : memref<1x128xf32, #tpu.memory_space<vmem>>, vector<1x128xf32>
    %5 = vector.broadcast %4 : vector<1x128xf32> to vector<16x128xf32>
    %6 = arith.addf %3, %5 : vector<16x128xf32>
    %cst_5 = arith.constant 0.000000e+00 : f32
    %7 = vector.broadcast %cst_5 : f32 to vector<16x128xf32>
    %8 = arith.maximumf %6, %7 : vector<16x128xf32>
    %9 = arith.truncf %8 : vector<16x128xf32> to vector<16x128xbf16>
    %c0_6 = arith.constant 0 : index
    %c0_7 = arith.constant 0 : index
    %10 = vector.load %arg4[%c0_6, %c0_7] : memref<128x128xbf16, #tpu.memory_space<vmem>>, vector<128x128xbf16>
    %cst_8 = arith.constant dense<0.000000e+00> : vector<16x128xf32>
    %11 = tpu.matmul %9, %10, %cst_8 {dimension_numbers = #tpu.dot_dimension_numbers<[1], [0], [0], [1], [0, 0, 1, 1], [], []>} : vector<16x128xbf16>, vector<128x128xbf16>, vector<16x128xf32> -> vector<16x128xf32>
    %c0_9 = arith.constant 0 : index
    %c0_10 = arith.constant 0 : index
    %12 = vector.load %arg5[%c0_9, %c0_10] : memref<1x128xf32, #tpu.memory_space<vmem>>, vector<1x128xf32>
    %13 = vector.broadcast %12 : vector<1x128xf32> to vector<16x128xf32>
    %14 = arith.addf %11, %13 : vector<16x128xf32>
    %cst_11 = arith.constant 0.000000e+00 : f32
    %15 = vector.broadcast %cst_11 : f32 to vector<16x128xf32>
    %16 = arith.maximumf %14, %15 : vector<16x128xf32>
    %17 = arith.truncf %16 : vector<16x128xf32> to vector<16x128xbf16>
    %c0_12 = arith.constant 0 : index
    %c0_13 = arith.constant 0 : index
    %18 = vector.load %arg6[%c0_12, %c0_13] : memref<128x16xbf16, #tpu.memory_space<vmem>>, vector<128x16xbf16>
    %cst_14 = arith.constant dense<0.000000e+00> : vector<16x16xf32>
    %19 = tpu.matmul %17, %18, %cst_14 {dimension_numbers = #tpu.dot_dimension_numbers<[1], [0], [0], [1], [0, 0, 1, 1], [], []>} : vector<16x128xbf16>, vector<128x16xbf16>, vector<16x16xf32> -> vector<16x16xf32>
    %c0_15 = arith.constant 0 : index
    %c0_16 = arith.constant 0 : index
    %20 = vector.load %arg7[%c0_15, %c0_16] : memref<1x16xf32, #tpu.memory_space<vmem>>, vector<1x16xf32>
    %21 = vector.broadcast %20 : vector<1x16xf32> to vector<16x16xf32>
    %22 = arith.addf %19, %21 : vector<16x16xf32>
    %c0_17 = arith.constant 0 : index
    %c0_18 = arith.constant 0 : index
    %23 = vector.load %arg8[%c0_17, %c0_18] : memref<16x16xf32, #tpu.memory_space<vmem>>, vector<16x16xf32>
    tpu.vector_store %arg8[%c0_17, %c0_18], %22 {strides = array<i32>} : memref<16x16xf32, #tpu.memory_space<vmem>>, vector<16x16xf32>,
    return
  }
  func.func @transform_0(%arg0: i32) -> (i32, i32) {
    %c0_i32 = arith.constant 0 : i32
    %c0_i32_0 = arith.constant 0 : i32
    return %arg0, %c0_i32 : i32, i32
  }
  func.func @transform_1(%arg0: i32) -> (i32, i32) {
    %c0_i32 = arith.constant 0 : i32
    %c0_i32_0 = arith.constant 0 : i32
    %c0_i32_1 = arith.constant 0 : i32
    return %c0_i32, %c0_i32_0 : i32, i32
  }
  func.func @transform_2(%arg0: i32) -> (i32, i32) {
    %c0_i32 = arith.constant 0 : i32
    %c0_i32_0 = arith.constant 0 : i32
    %c0_i32_1 = arith.constant 0 : i32
    return %c0_i32, %c0_i32_0 : i32, i32
  }
  func.func @transform_3(%arg0: i32) -> (i32, i32) {
    %c0_i32 = arith.constant 0 : i32
    %c0_i32_0 = arith.constant 0 : i32
    %c0_i32_1 = arith.constant 0 : i32
    return %c0_i32, %c0_i32_0 : i32, i32
  }
  func.func @transform_4(%arg0: i32) -> (i32, i32) {
    %c0_i32 = arith.constant 0 : i32
    %c0_i32_0 = arith.constant 0 : i32
    %c0_i32_1 = arith.constant 0 : i32
    return %c0_i32, %c0_i32_0 : i32, i32
  }
  func.func @transform_5(%arg0: i32) -> (i32, i32) {
    %c0_i32 = arith.constant 0 : i32
    %c0_i32_0 = arith.constant 0 : i32
    %c0_i32_1 = arith.constant 0 : i32
    return %c0_i32, %c0_i32_0 : i32, i32
  }
  func.func @transform_6(%arg0: i32) -> (i32, i32) {
    %c0_i32 = arith.constant 0 : i32
    %c0_i32_0 = arith.constant 0 : i32
    %c0_i32_1 = arith.constant 0 : i32
    return %c0_i32, %c0_i32_0 : i32, i32
  }
  func.func @transform_7(%arg0: i32) -> (i32, i32) {
    %c0_i32 = arith.constant 0 : i32
    %c0_i32_0 = arith.constant 0 : i32
    return %arg0, %c0_i32 : i32, i32
  }
}

module attributes {stable_mosaic.version = 11 : i64} {
  func.func @_mlp2_kernel(%arg0: i32, %arg1: memref<16x32xf32, #tpu.memory_space<vmem>>, %arg2: memref<32x128xbf16, #tpu.memory_space<vmem>>, %arg3: memref<1x128xf32, #tpu.memory_space<vmem>>, %arg4: memref<128x128xbf16, #tpu.memory_space<vmem>>, %arg5: memref<1x128xf32, #tpu.memory_space<vmem>>, %arg6: memref<128x16xbf16, #tpu.memory_space<vmem>>, %arg7: memref<1x16xf32, #tpu.memory_space<vmem>>, %arg8: memref<16x16xf32, #tpu.memory_space<vmem>>) attributes {dimension_semantics = [#tpu.dimension_semantics<parallel>], iteration_bounds = array<i64: 1>, scalar_prefetch = 0 : i64, scratch_operands = 0 : i64, tpu.core_type = #tpu.core_type<tc>, window_params = [{transform_indices = @transform_0, window_bounds = array<i64: 16, 32>}, {pipeline_mode = #tpu.pipeline_mode<synchronous>, transform_indices = @transform_1, window_bounds = array<i64: 32, 128>}, {pipeline_mode = #tpu.pipeline_mode<synchronous>, transform_indices = @transform_2, window_bounds = array<i64: 1, 128>}, {pipeline_mode = #tpu.pipeline_mode<synchronous>, transform_indices = @transform_3, window_bounds = array<i64: 128, 128>}, {pipeline_mode = #tpu.pipeline_mode<synchronous>, transform_indices = @transform_4, window_bounds = array<i64: 1, 128>}, {pipeline_mode = #tpu.pipeline_mode<synchronous>, transform_indices = @transform_5, window_bounds = array<i64: 128, 16>}, {pipeline_mode = #tpu.pipeline_mode<synchronous>, transform_indices = @transform_6, window_bounds = array<i64: 1, 16>}, {transform_indices = @transform_7, window_bounds = array<i64: 16, 16>}]} {
    %c0 = arith.constant 0 : index
    %c0_0 = arith.constant 0 : index
    %0 = vector.load %arg1[%c0, %c0_0] : memref<16x32xf32, #tpu.memory_space<vmem>>, vector<16x32xf32>
    %1 = arith.truncf %0 : vector<16x32xf32> to vector<16x32xbf16>
    %c0_1 = arith.constant 0 : index
    %c0_2 = arith.constant 0 : index
    %2 = vector.load %arg2[%c0_1, %c0_2] : memref<32x128xbf16, #tpu.memory_space<vmem>>, vector<32x128xbf16>
    %cst = arith.constant dense<0.000000e+00> : vector<16x128xf32>
    %3 = tpu.matmul %1, %2, %cst {dimension_numbers = #tpu.dot_dimension_numbers<[1], [0], [0], [1], [0, 0, 1, 1], [], []>} : vector<16x32xbf16>, vector<32x128xbf16>, vector<16x128xf32> -> vector<16x128xf32>
    %c0_3 = arith.constant 0 : index
    %c0_4 = arith.constant 0 : index
    %4 = vector.load %arg3[%c0_3, %c0_4] : memref<1x128xf32, #tpu.memory_space<vmem>>, vector<1x128xf32>
    %5 = vector.broadcast %4 : vector<1x128xf32> to vector<16x128xf32>
    %6 = arith.addf %3, %5 : vector<16x128xf32>
    %cst_5 = arith.constant 0.000000e+00 : f32
    %7 = vector.broadcast %cst_5 : f32 to vector<16x128xf32>
    %8 = arith.maximumf %6, %7 : vector<16x128xf32>
    %9 = arith.truncf %8 : vector<16x128xf32> to vector<16x128xbf16>
    %c0_6 = arith.constant 0 : index
    %c0_7 = arith.constant 0 : index
    %10 = vector.load %arg4[%c0_6, %c0_7] : memref<128x128xbf16, #tpu.memory_space<vmem>>, vector<128x128xbf16>
    %cst_8 = arith.constant dense<0.000000e+00> : vector<16x128xf32>
    %11 = tpu.matmul %9, %10, %cst_8 {dimension_numbers = #tpu.dot_dimension_numbers<[1], [0], [0], [1], [0, 0, 1, 1], [], []>} : vector<16x128xbf16>, vector<128x128xbf16>, vector<16x128xf32> -> vector<16x128xf32>
    %c0_9 = arith.constant 0 : index
    %c0_10 = arith.constant 0 : index
    %12 = vector.load %arg5[%c0_9, %c0_10] : memref<1x128xf32, #tpu.memory_space<vmem>>, vector<1x128xf32>
    %13 = vector.broadcast %12 : vector<1x128xf32> to vector<16x128xf32>
    %14 = arith.addf %11, %13 : vector<16x128xf32>
    %cst_11 = arith.constant 0.000000e+00 : f32
    %15 = vector.broadcast %cst_11 : f32 to vector<16x128xf32>
    %16 = arith.maximumf %14, %15 : vector<16x128xf32>
    %17 = arith.truncf %16 : vector<16x128xf32> to vector<16x128xbf16>
    %c0_12 = arith.constant 0 : index
    %c0_13 = arith.constant 0 : index
    %18 = vector.load %arg6[%c0_12, %c0_13] : memref<128x16xbf16, #tpu.memory_space<vmem>>, vector<128x16xbf16>
    %cst_14 = arith.constant dense<0.000000e+00> : vector<16x16xf32>
    %19 = tpu.matmul %17, %18, %cst_14 {dimension_numbers = #tpu.dot_dimension_numbers<[1], [0], [0], [1], [0, 0, 1, 1], [], []>} : vector<16x128xbf16>, vector<128x16xbf16>, vector<16x16xf32> -> vector<16x16xf32>
    %c0_15 = arith.constant 0 : index
    %c0_16 = arith.constant 0 : index
    %20 = vector.load %arg7[%c0_15, %c0_16] : memref<1x16xf32, #tpu.memory_space<vmem>>, vector<1x16xf32>
    %21 = vector.broadcast %20 : vector<1x16xf32> to vector<16x16xf32>
    %22 = arith.addf %19, %21 : vector<16x16xf32>
    %c0_17 = arith.constant 0 : index
    %c0_18 = arith.constant 0 : index
    %23 = vector.load %arg8[%c0_17, %c0_18] : memref<16x16xf32, #tpu.memory_space<vmem>>, vector<16x16xf32>
    tpu.vector_store %arg8[%c0_17, %c0_18], %22 {strides = array<i32>} : memref<16x16xf32, #tpu.memory_space<vmem>>, vector<16x16xf32>,
    return
  }
  func.func @transform_0(%arg0: i32) -> (i32, i32) {
    %c0_i32 = arith.constant 0 : i32
    %c0_i32_0 = arith.constant 0 : i32
    return %arg0, %c0_i32 : i32, i32
  }
  func.func @transform_1(%arg0: i32) -> (i32, i32) {
    %c0_i32 = arith.constant 0 : i32
    %c0_i32_0 = arith.constant 0 : i32
    %c0_i32_1 = arith.constant 0 : i32
    return %c0_i32, %c0_i32_0 : i32, i32
  }
  func.func @transform_2(%arg0: i32) -> (i32, i32) {
    %c0_i32 = arith.constant 0 : i32
    %c0_i32_0 = arith.constant 0 : i32
    %c0_i32_1 = arith.constant 0 : i32
    return %c0_i32, %c0_i32_0 : i32, i32
  }
  func.func @transform_3(%arg0: i32) -> (i32, i32) {
    %c0_i32 = arith.constant 0 : i32
    %c0_i32_0 = arith.constant 0 : i32
    %c0_i32_1 = arith.constant 0 : i32
    return %c0_i32, %c0_i32_0 : i32, i32
  }
  func.func @transform_4(%arg0: i32) -> (i32, i32) {
    %c0_i32 = arith.constant 0 : i32
    %c0_i32_0 = arith.constant 0 : i32
    %c0_i32_1 = arith.constant 0 : i32
    return %c0_i32, %c0_i32_0 : i32, i32
  }
  func.func @transform_5(%arg0: i32) -> (i32, i32) {
    %c0_i32 = arith.constant 0 : i32
    %c0_i32_0 = arith.constant 0 : i32
    %c0_i32_1 = arith.constant 0 : i32
    return %c0_i32, %c0_i32_0 : i32, i32
  }
  func.func @transform_6(%arg0: i32) -> (i32, i32) {
    %c0_i32 = arith.constant 0 : i32
    %c0_i32_0 = arith.constant 0 : i32
    %c0_i32_1 = arith.constant 0 : i32
    return %c0_i32, %c0_i32_0 : i32, i32
  }
  func.func @transform_7(%arg0: i32) -> (i32, i32) {
    %c0_i32 = arith.constant 0 : i32
    %c0_i32_0 = arith.constant 0 : i32
    return %arg0, %c0_i32 : i32, i32
  }
}

</mosaic_0001>

<bundles_post_ra>
// kernel: tpu_custom_call.1
= control target key start
LH: loop header
LB: loop body
LE: loop exit
PB: predicated region body
PF: predicated region fallthrough
CT: control target
= control target key end

     0   :  { %12 = vsyncpa [#allocation3], 0  ;;  %s592_s0 = inlined_call_operand.hbm [shape: f32[16,32], index: 0, kind: input, shape index: {}]   ;;  %s593_s1 = inlined_call_operand.hbm [shape: bf16[32,128], index: 1, kind: input, shape index: {}]   ;;  %s594_s2 = inlined_call_operand.vmem [shape: f32[1,128], index: 2, kind: input, shape index: {}]   ;;  %s595_s3 = inlined_call_operand.vmem [shape: bf16[128,128], index: 3, kind: input, shape index: {}]   ;;  %s596_s4 = inlined_call_operand.vmem [shape: f32[1,128], index: 4, kind: input, shape index: {}]   ;;  %s597_s5 = inlined_call_operand.vmem [shape: bf16[128,16], index: 5, kind: input, shape index: {}]   ;;  %s598_s6 = inlined_call_operand.vmem [shape: f32[1,16], index: 6, kind: input, shape index: {}]   ;;  %s599_s7 = inlined_call_operand.hbm [shape: f32[16,16], index: 7, kind: output, shape index: {}]  }
   0x1   :  { %13 = vsyncpa [#allocation6], 0 }
   0x2   :  { %14 = vsyncpa [#allocation4], 0  ;;  %s19_s26 = sshll.u32 %s592_s0, 4  ;;  %s473_s27 = smov [#allocation2]   ;;  %s20_s26 = int_to_ptr.hbm [resolvable:$true] %s19_s26 }
   0x3   :  { %s21_s28 = sshll.u32 %s473_s27, 4  ;;  %s32_s8 = sshll.u32 %s593_s1, 4  ;;  %s22_s28 = int_to_ptr.vmem [resolvable:$true] %s21_s28  ;;  %s33_s8 = int_to_ptr.hbm [resolvable:$true] %s32_s8 }
   0x4   :  { %s474_s9 = smov 128   ;;  %s475_s10 = smov 8  }
   0x5   :  { %27 = dma.hbm_to_vmem [thread:$0]  %s20_s26, 256, %s22_s28, [#allocation3], %s474_s9, %s474_s9, %s475_s10  }
   0x6   :  { %s476_s11 = smov [#allocation5]   ;;  %s477_s13 = smov 64  }
   0x7   :  { %s34_s12 = sshll.u32 %s476_s11, 4  ;;  %s478_s0 = smov 4   ;;  %s35_s12 = int_to_ptr.vmem [resolvable:$true] %s34_s12 }
   0x8   :  { %40 = dma.hbm_to_vmem [thread:$0]  %s33_s8, 256, %s35_s12, [#allocation6], %s477_s13, %s477_s13, %s478_s0  }
   0x9   :  { %467 = dma.done.wait [#allocation3], 256  }
   0xa   :  { %468 = vsyncadd [#allocation3], 4294967040 }
   0xb   :  { %469 = dma.done.wait [#allocation6], 256  }
   0xc   :  { %470 = vsyncadd [#allocation6], 4294967040  ;;  %v368_v0 = vld [vmem:[#allocation5 + $0x8] sm:$0xff]  ;;  %v367_v1 = vld [vmem:[#allocation5] sm:$0xff]  ;;  %vm83_vm0 = vcmask 261120   ;;  %vm271_vm1 = vcmask 130048  }
   0xd   :  { %v376_v2 = vld [vmem:[%s595_s3 + $0x38] sm:$0xff]  ;;  %93 = vmatpush.bf16.msra.mxu0 %v368_v0  ;;  %v60_v3 = vld [vmem:[#allocation2] sm:$0xff]  ;;  %v61_v4 = vld [vmem:[#allocation2 + $0x8] sm:$0xff] }
   0xe   :  { %172 = vmatpush.bf16.msra.mxu1 %v376_v2  ;;  %v375_v5 = vld [vmem:[%s595_s3 + $0x30] sm:$0xff]  ;;  %v62_v6 = vpack.c.bf16 %v61_v4, %v60_v3  ;;  %v374_v7 = vld [vmem:[%s595_s3 + $0x28] sm:$0xff]  ;;  %v373_v8 = vld [vmem:[%s595_s3 + $0x20] sm:$0xff] }
   0xf   :  { %v372_v9 = vld [vmem:[%s595_s3 + $0x18] sm:$0xff]  ;;  %v371_v10 = vld [vmem:[%s595_s3 + $0x10] sm:$0xff]  ;;  %v370_v11 = vld [vmem:[%s595_s3 + $0x8] sm:$0xff] }
  0x10   :  { %v369_v12 = vld [vmem:[%s595_s3] sm:$0xff]  ;;  %v384_v13 = vld [vmem:[%s597_s5 + $0x38] sm:$0xff]  ;;  %v383_v14 = vld [vmem:[%s597_s5 + $0x30] sm:$0xff] }
  0x11   :  { %94 = vmatpush.bf16.msra.mxu0 %v367_v1  ;;  %257 = vmatpush.bf16.msra.mxu2 %v384_v13  ;;  %v382_v15 = vld [vmem:[%s597_s5 + $0x28] sm:$0xff]  ;;  %v381_v16 = vld [vmem:[%s597_s5 + $0x20] sm:$0xff]  ;;  %v380_v25 = vld [vmem:[%s597_s5 + $0x18] sm:$0xff] }
  0x12   :  { %173 = vmatpush.bf16.msra.mxu1 %v375_v5  ;;  %v392_v18 = vld [vmem:[%s594_s2] ss:$0 sm:$0xff]  ;;  %v379_v26 = vld [vmem:[%s597_s5 + $0x10] sm:$0xff]  ;;  %v378_v27 = vld [vmem:[%s597_s5 + $0x8] sm:$0xff] }
  0x13   :  { %v377_v28 = vld [vmem:[%s597_s5] sm:$0xff]  ;;  %s479_s5 = smov [#allocation7]  }
  0x14   :  { %302 = vmatmul.msk.bf16.vlgmr.msra.gmra.mxu0 %vm83_vm0, %v62_v6  ;;  %v393_v30 = vld [vmem:[%s596_s4] ss:$0 sm:$0xff]  ;;  %s278_s26 = sshll.u32 %s479_s5, 4  ;;  %s280_s4 = sshll.u32 %s599_s7, 4  ;;  %s279_s26 = int_to_ptr.vmem [resolvable:$true] %s278_s26  ;;  %s281_s4 = int_to_ptr.hbm [resolvable:$true] %s280_s4 }
  0x15   :  { %258 = vmatpush.bf16.msra.mxu2 %v383_v14  ;;  %v394_v37 = vld [vmem:[%s598_s6] ss:$0 sm:$0xff] }
  0x16   :  { %174 = vmatpush.bf16.msra.mxu1 %v374_v7 }
  0x19   :  { %259 = vmatpush.bf16.msra.mxu2 %v382_v15 }
  0x1a   :  { %175 = vmatpush.bf16.msra.mxu1 %v373_v8 }
  0x1d   :  { %260 = vmatpush.bf16.msra.mxu2 %v381_v16 }
  0x1e   :  { %176 = vmatpush.bf16.msra.mxu1 %v372_v9 }
  0x21   :  { %261 = vmatpush.bf16.msra.mxu2 %v380_v25 }
  0x22   :  { %177 = vmatpush.bf16.msra.mxu1 %v371_v10 }
  0x25   :  { %262 = vmatpush.bf16.msra.mxu2 %v379_v26 }
  0x26   :  { %178 = vmatpush.bf16.msra.mxu1 %v370_v11 }
  0x29   :  { %263 = vmatpush.bf16.msra.mxu2 %v378_v27 }
  0x2a   :  { %179 = vmatpush.bf16.msra.mxu1 %v369_v12 }
  0x2d   :  { %264 = vmatpush.bf16.msra.mxu2 %v377_v28 }
  0x91   :  { %v96_v17 = vpop.f32.mrf.mxu0 }
  0x92   :  { %v97_v19 = vadd.f32 %v392_v18, %v96_v17 }
  0x94   :  { %v101_v22 = vmax.f32 %v97_v19, 0.0 }
  0x99   :  { %v98_v20 = vpop.f32.mrf.mxu0 }
  0x9a   :  { %v99_v21 = vadd.f32 %v392_v18, %v98_v20 }
  0x9c   :  { %v102_v23 = vmax.f32 %v99_v21, 0.0 }
  0x9e   :  { %v103_v24 = vpack.c.bf16 %v102_v23, %v101_v22 }
  0xa0   :  { %180 = vmatmul.bf16.vlgmr.msra.gmra.mxu1 %v103_v24 }
 0x11d   :  { %v181_v29 = vpop.f32.mrf.mxu1 }
 0x11e   :  { %v182_v31 = vadd.f32 %v393_v30, %v181_v29 }
 0x120   :  { %v186_v34 = vmax.f32 %v182_v31, 0.0 }
 0x125   :  { %v183_v32 = vpop.f32.mrf.mxu1 }
 0x126   :  { %v184_v33 = vadd.f32 %v393_v30, %v183_v32 }
 0x128   :  { %v187_v35 = vmax.f32 %v184_v33, 0.0 }
 0x12a   :  { %v188_v36 = vpack.c.bf16 %v187_v35, %v186_v34 }
 0x12c   :  { %265 = vmatmul.bf16.vlgmr.msra.gmra.mxu2 %v188_v36 }
 0x1af   :  { %v266_v38 = vpop.f32.mrf.mxu2 }
 0x1b0   :  { %v267_v39 = vadd.f32 %v394_v37, %v266_v38 }
 0x1b2   :  { %272 = vst.msk [vmem:[#allocation7] sm:$0xff] %vm271_vm1, %v267_v39 }
 0x1b7   :  { %v268_v40 = vpop.f32.mrf.mxu2 }
 0x1b8   :  { %v269_v41 = vadd.f32 %v394_v37, %v268_v40 }
 0x1ba   :  { %273 = vst.msk [vmem:[#allocation7 + $0x8] sm:$0xff] %vm271_vm1, %v269_v41 }
 0x1bb   :  { %286 = dma.vmem_to_hbm [thread:$0]  %s279_s26, 256, %s281_s4, [#allocation4], %s474_s9, %s474_s9, %s475_s10  }
 0x1bc   :  { %471 = dma.done.wait [#allocation4], 256  }
 0x1bd   :  { %472 = vsyncadd [#allocation4], 4294967040 }
 0x1be   :  { %291 = vsyncpa [#allocation3], 1 }
 0x1bf   :  { %292 = vsyncpa [#allocation6], 1 }
 0x1c0   :  { %293 = vsyncpa [#allocation4], 1 }

// kernel: tpu_custom_call.1
= control target key start
LH: loop header
LB: loop body
LE: loop exit
PB: predicated region body
PF: predicated region fallthrough
CT: control target
= control target key end

     0   :  { %12 = vsyncpa [#allocation3], 0  ;;  %s592_s0 = inlined_call_operand.hbm [shape: f32[16,32], index: 0, kind: input, shape index: {}]   ;;  %s593_s1 = inlined_call_operand.hbm [shape: bf16[32,128], index: 1, kind: input, shape index: {}]   ;;  %s594_s2 = inlined_call_operand.vmem [shape: f32[1,128], index: 2, kind: input, shape index: {}]   ;;  %s595_s3 = inlined_call_operand.vmem [shape: bf16[128,128], index: 3, kind: input, shape index: {}]   ;;  %s596_s4 = inlined_call_operand.vmem [shape: f32[1,128], index: 4, kind: input, shape index: {}]   ;;  %s597_s5 = inlined_call_operand.vmem [shape: bf16[128,16], index: 5, kind: input, shape index: {}]   ;;  %s598_s6 = inlined_call_operand.vmem [shape: f32[1,16], index: 6, kind: input, shape index: {}]   ;;  %s599_s7 = inlined_call_operand.hbm [shape: f32[16,16], index: 7, kind: output, shape index: {}]  }
   0x1   :  { %13 = vsyncpa [#allocation6], 0 }
   0x2   :  { %14 = vsyncpa [#allocation4], 0  ;;  %s19_s26 = sshll.u32 %s592_s0, 4  ;;  %s473_s27 = smov [#allocation2]   ;;  %s20_s26 = int_to_ptr.hbm [resolvable:$true] %s19_s26 }
   0x3   :  { %s21_s28 = sshll.u32 %s473_s27, 4  ;;  %s32_s8 = sshll.u32 %s593_s1, 4  ;;  %s22_s28 = int_to_ptr.vmem [resolvable:$true] %s21_s28  ;;  %s33_s8 = int_to_ptr.hbm [resolvable:$true] %s32_s8 }
   0x4   :  { %s474_s9 = smov 128   ;;  %s475_s10 = smov 8  }
   0x5   :  { %27 = dma.hbm_to_vmem [thread:$0]  %s20_s26, 256, %s22_s28, [#allocation3], %s474_s9, %s474_s9, %s475_s10  }
   0x6   :  { %s476_s11 = smov [#allocation5]   ;;  %s477_s13 = smov 64  }
   0x7   :  { %s34_s12 = sshll.u32 %s476_s11, 4  ;;  %s478_s0 = smov 4   ;;  %s35_s12 = int_to_ptr.vmem [resolvable:$true] %s34_s12 }
   0x8   :  { %40 = dma.hbm_to_vmem [thread:$0]  %s33_s8, 256, %s35_s12, [#allocation6], %s477_s13, %s477_s13, %s478_s0  }
   0x9   :  { %467 = dma.done.wait [#allocation3], 256  }
   0xa   :  { %468 = vsyncadd [#allocation3], 4294967040 }
   0xb   :  { %469 = dma.done.wait [#allocation6], 256  }
   0xc   :  { %470 = vsyncadd [#allocation6], 4294967040  ;;  %v368_v0 = vld [vmem:[#allocation5 + $0x8] sm:$0xff]  ;;  %v367_v1 = vld [vmem:[#allocation5] sm:$0xff]  ;;  %vm83_vm0 = vcmask 261120   ;;  %vm271_vm1 = vcmask 130048  }
   0xd   :  { %v376_v2 = vld [vmem:[%s595_s3 + $0x38] sm:$0xff]  ;;  %93 = vmatpush.bf16.msra.mxu0 %v368_v0  ;;  %v60_v3 = vld [vmem:[#allocation2] sm:$0xff]  ;;  %v61_v4 = vld [vmem:[#allocation2 + $0x8] sm:$0xff] }
   0xe   :  { %172 = vmatpush.bf16.msra.mxu1 %v376_v2  ;;  %v375_v5 = vld [vmem:[%s595_s3 + $0x30] sm:$0xff]  ;;  %v62_v6 = vpack.c.bf16 %v61_v4, %v60_v3  ;;  %v374_v7 = vld [vmem:[%s595_s3 + $0x28] sm:$0xff]  ;;  %v373_v8 = vld [vmem:[%s595_s3 + $0x20] sm:$0xff] }
   0xf   :  { %v372_v9 = vld [vmem:[%s595_s3 + $0x18] sm:$0xff]  ;;  %v371_v10 = vld [vmem:[%s595_s3 + $0x10] sm:$0xff]  ;;  %v370_v11 = vld [vmem:[%s595_s3 + $0x8] sm:$0xff] }
  0x10   :  { %v369_v12 = vld [vmem:[%s595_s3] sm:$0xff]  ;;  %v384_v13 = vld [vmem:[%s597_s5 + $0x38] sm:$0xff]  ;;  %v383_v14 = vld [vmem:[%s597_s5 + $0x30] sm:$0xff] }
  0x11   :  { %94 = vmatpush.bf16.msra.mxu0 %v367_v1  ;;  %257 = vmatpush.bf16.msra.mxu2 %v384_v13  ;;  %v382_v15 = vld [vmem:[%s597_s5 + $0x28] sm:$0xff]  ;;  %v381_v16 = vld [vmem:[%s597_s5 + $0x20] sm:$0xff]  ;;  %v380_v25 = vld [vmem:[%s597_s5 + $0x18] sm:$0xff] }
  0x12   :  { %173 = vmatpush.bf16.msra.mxu1 %v375_v5  ;;  %v392_v18 = vld [vmem:[%s594_s2] ss:$0 sm:$0xff]  ;;  %v379_v26 = vld [vmem:[%s597_s5 + $0x10] sm:$0xff]  ;;  %v378_v27 = vld [vmem:[%s597_s5 + $0x8] sm:$0xff] }
  0x13   :  { %v377_v28 = vld [vmem:[%s597_s5] sm:$0xff]  ;;  %s479_s5 = smov [#allocation7]  }
  0x14   :  { %302 = vmatmul.msk.bf16.vlgmr.msra.gmra.mxu0 %vm83_vm0, %v62_v6  ;;  %v393_v30 = vld [vmem:[%s596_s4] ss:$0 sm:$0xff]  ;;  %s278_s26 = sshll.u32 %s479_s5, 4  ;;  %s280_s4 = sshll.u32 %s599_s7, 4  ;;  %s279_s26 = int_to_ptr.vmem [resolvable:$true] %s278_s26  ;;  %s281_s4 = int_to_ptr.hbm [resolvable:$true] %s280_s4 }
  0x15   :  { %258 = vmatpush.bf16.msra.mxu2 %v383_v14  ;;  %v394_v37 = vld [vmem:[%s598_s6] ss:$0 sm:$0xff] }
  0x16   :  { %174 = vmatpush.bf16.msra.mxu1 %v374_v7 }
  0x19   :  { %259 = vmatpush.bf16.msra.mxu2 %v382_v15 }
  0x1a   :  { %175 = vmatpush.bf16.msra.mxu1 %v373_v8 }
  0x1d   :  { %260 = vmatpush.bf16.msra.mxu2 %v381_v16 }
  0x1e   :  { %176 = vmatpush.bf16.msra.mxu1 %v372_v9 }
  0x21   :  { %261 = vmatpush.bf16.msra.mxu2 %v380_v25 }
  0x22   :  { %177 = vmatpush.bf16.msra.mxu1 %v371_v10 }
  0x25   :  { %262 = vmatpush.bf16.msra.mxu2 %v379_v26 }
  0x26   :  { %178 = vmatpush.bf16.msra.mxu1 %v370_v11 }
  0x29   :  { %263 = vmatpush.bf16.msra.mxu2 %v378_v27 }
  0x2a   :  { %179 = vmatpush.bf16.msra.mxu1 %v369_v12 }
  0x2d   :  { %264 = vmatpush.bf16.msra.mxu2 %v377_v28 }
  0x91   :  { %v96_v17 = vpop.f32.mrf.mxu0 }
  0x92   :  { %v97_v19 = vadd.f32 %v392_v18, %v96_v17 }
  0x94   :  { %v101_v22 = vmax.f32 %v97_v19, 0.0 }
  0x99   :  { %v98_v20 = vpop.f32.mrf.mxu0 }
  0x9a   :  { %v99_v21 = vadd.f32 %v392_v18, %v98_v20 }
  0x9c   :  { %v102_v23 = vmax.f32 %v99_v21, 0.0 }
  0x9e   :  { %v103_v24 = vpack.c.bf16 %v102_v23, %v101_v22 }
  0xa0   :  { %180 = vmatmul.bf16.vlgmr.msra.gmra.mxu1 %v103_v24 }
 0x11d   :  { %v181_v29 = vpop.f32.mrf.mxu1 }
 0x11e   :  { %v182_v31 = vadd.f32 %v393_v30, %v181_v29 }
 0x120   :  { %v186_v34 = vmax.f32 %v182_v31, 0.0 }
 0x125   :  { %v183_v32 = vpop.f32.mrf.mxu1 }
 0x126   :  { %v184_v33 = vadd.f32 %v393_v30, %v183_v32 }
 0x128   :  { %v187_v35 = vmax.f32 %v184_v33, 0.0 }
 0x12a   :  { %v188_v36 = vpack.c.bf16 %v187_v35, %v186_v34 }
 0x12c   :  { %265 = vmatmul.bf16.vlgmr.msra.gmra.mxu2 %v188_v36 }
 0x1af   :  { %v266_v38 = vpop.f32.mrf.mxu2 }
 0x1b0   :  { %v267_v39 = vadd.f32 %v394_v37, %v266_v38 }
 0x1b2   :  { %272 = vst.msk [vmem:[#allocation7] sm:$0xff] %vm271_vm1, %v267_v39 }
 0x1b7   :  { %v268_v40 = vpop.f32.mrf.mxu2 }
 0x1b8   :  { %v269_v41 = vadd.f32 %v394_v37, %v268_v40 }
 0x1ba   :  { %273 = vst.msk [vmem:[#allocation7 + $0x8] sm:$0xff] %vm271_vm1, %v269_v41 }
 0x1bb   :  { %286 = dma.vmem_to_hbm [thread:$0]  %s279_s26, 256, %s281_s4, [#allocation4], %s474_s9, %s474_s9, %s475_s10  }
 0x1bc   :  { %471 = dma.done.wait [#allocation4], 256  }
 0x1bd   :  { %472 = vsyncadd [#allocation4], 4294967040 }
 0x1be   :  { %291 = vsyncpa [#allocation3], 1 }
 0x1bf   :  { %292 = vsyncpa [#allocation6], 1 }
 0x1c0   :  { %293 = vsyncpa [#allocation4], 1 }

</bundles_post_ra>
